<compile_context>
chip_gen: v7x
topology: tpu7x:2x2x1
jax: 0.10.0
libtpu: 0.0.40
codegen_flags: <defaults>
</compile_context>

<pallas_src>
import functools

import jax
import jax.numpy as jnp
from jax.experimental import pallas as pl
from jax.experimental.pallas import tpu as pltpu


def _round_up(x, m):
    return ((x + m - 1) // m) * m


def _cdiv(a, b):
    return (a + b - 1) // b


def _vmem_footprint_bytes(tm, tn4, H, x_bytes, w_bytes, out_bytes):
    """Approximate VMEM demand for one grid step (x/out single-buffered)."""
    f = 0
    f += tm * H * x_bytes              # resident x tile
    f += tm * H * out_bytes            # resident output tile
    f += tm * H * w_bytes              # LayerNorm scratch (MXU input dtype)
    f += tm * H * 4                    # f32 accumulator scratch
    f += 2 * H * tn4 * w_bytes         # W1 chunk, double-buffered
    f += 2 * tn4 * H * w_bytes         # W2 chunk, double-buffered
    f += 2 * (2 * tn4 + 4 * H) * 4     # biases / LN params
    f += 4 * tm * tn4 * 4              # live h / gelu intermediates (headroom)
    return f


def residual_mlp_kernel(x_ref, g_ref, beta_ref, w1_ref, b1_ref, w2_ref, b2_ref,
                        o_ref, xn_ref, acc_ref, *, compute_dtype):
    j = pl.program_id(1)

    # ---- once per row tile: LayerNorm -> xn scratch; residual + b2 -> acc ----
    @pl.when(j == 0)
    def _init():
        x = x_ref[...].astype(jnp.float32)                       # (TM, H)
        mu = jnp.mean(x, axis=-1, keepdims=True)
        xc = x - mu
        var = jnp.mean(xc * xc, axis=-1, keepdims=True)
        inv = jax.lax.rsqrt(var + 1e-5)
        xn = xc * inv * g_ref[...].astype(jnp.float32) + beta_ref[...].astype(jnp.float32)
        xn_ref[...] = xn.astype(xn_ref.dtype)                    # bf16 for the MXU
        # Fold residual + output bias into the accumulator init: the finalize
        # step becomes a pure cast + store (no x reload in the epilogue).
        acc_ref[...] = x + b2_ref[...].astype(jnp.float32)

    # ---- dense_4h chunk: (TM, H) @ (H, TN4), f32 accumulation on the MXU ----
    h = jnp.dot(xn_ref[...], w1_ref[...], preferred_element_type=jnp.float32)

    # ---- bias + gelu (tanh approx, fused constants) in compute_dtype --------
    h = h.astype(compute_dtype) + b1_ref[...].astype(compute_dtype)
    c1 = 0.7978845608028654            # sqrt(2/pi)
    c2 = c1 * 0.044715
    t = jnp.tanh(h * (c1 + c2 * (h * h)))      # tanh runs on the EUP slot
    g = (0.5 * h) * (1.0 + t)

    # ---- dense_h chunk: accumulate (TM, TN4) @ (TN4, H) into f32 scratch ----
    acc_ref[...] += jnp.dot(g.astype(w2_ref.dtype), w2_ref[...],
                            preferred_element_type=jnp.float32)

    # ---- last chunk: single lane-dense store ----
    @pl.when(j == pl.num_programs(1) - 1)
    def _finalize():
        o_ref[...] = acc_ref[...].astype(o_ref.dtype)


def residual_mlp(x2d, ln_w, ln_b, w1_t, b1, w2_t, b2, *,
                 tm=512, tn4=1024, vmem_limit_bytes=None, gelu_dtype=None):
    """x2d: (M, H).  w1_t: (H, 4H), w2_t: (4H, H) (already transposed to in,out)."""
    M, H = x2d.shape
    H4 = w1_t.shape[1]
    assert w1_t.shape == (H, H4) and w2_t.shape == (H4, H)
    assert b1.shape == (1, H4) and b2.shape == (1, H)
    assert ln_w.shape == (1, H) and ln_b.shape == (1, H)

    w_dtype = w1_t.dtype
    # bf16 VPU/EUP on v6e/v7x: run the bias+GELU chain in bf16 when the MXU
    # inputs are bf16 anyway.  Override with gelu_dtype=jnp.float32 on v5e.
    if gelu_dtype is None:
        gelu_dtype = jnp.bfloat16 if w_dtype == jnp.bfloat16 else jnp.float32

    # ---- chip-aware VMEM budget (v7x only has 64 MiB/TC; never ask for all) --
    if vmem_limit_bytes is None:
        try:
            vmem_cap = int(pltpu.get_tpu_info().vmem_capacity_bytes)
            vmem_limit_bytes = min(100 * 1024 * 1024, int(vmem_cap * 0.8))
        except Exception:
            vmem_limit_bytes = 64 * 1024 * 1024   # conservative, fits all gens
    budget = int(vmem_limit_bytes * 0.85)         # headroom for compiler scratch

    x_bytes = x2d.dtype.itemsize
    w_bytes = w1_t.dtype.itemsize

    # ---- row tile: multiple of 8 sublanes, clamped for tiny inputs ----------
    tm = max(8, min(tm, _round_up(M, 8)))
    tm = _round_up(tm, 8)
    # v7x has 2 TensorCores: keep >= 2 row tiles for medium M so the parallel
    # grid axis can be sharded across both cores.
    if M > 256 and _cdiv(M, tm) < 2:
        tm = max(256, _round_up(_cdiv(M, 2), 8))

    # ---- 4H chunk width: multiple of 128 lanes -------------------------------
    tn4 = max(128, min(tn4, _round_up(H4, 128)))
    tn4 = (tn4 // 128) * 128

    # ---- shrink tiles until the footprint fits the budget --------------------
    def _fits():
        return _vmem_footprint_bytes(tm, tn4, H, x_bytes, w_bytes, x_bytes) <= budget

    while not _fits() and tn4 > 512:
        tn4 = max(512, (tn4 // 2 // 128) * 128)
    while not _fits() and tm > 256:
        tm = max(256, _round_up(tm // 2, 8))
    while not _fits() and tn4 > 128:
        tn4 = max(128, (tn4 // 2 // 128) * 128)
    while not _fits() and tm > 8:
        tm = max(8, _round_up(tm // 2, 8))

    # ---- pad the 4H dim once (weights only) if tn4 does not divide it -------
    # Zero padding is exact: gelu(0 + 0) == 0 and zero rows of W2 contribute 0.
    H4p = _round_up(H4, tn4)
    if H4p != H4:
        w1_t = jnp.pad(w1_t, ((0, 0), (0, H4p - H4)))
        b1 = jnp.pad(b1, ((0, 0), (0, H4p - H4)))
        w2_t = jnp.pad(w2_t, ((0, H4p - H4), (0, 0)))

    # Ragged M handled by the grid itself (OOB rows are masked on store): no
    # host-side jnp.pad / [:M] slice copies of the (M, H) activations.
    grid = (_cdiv(M, tm), H4p // tn4)
    n_row_tiles = grid[0]

    cost = pl.CostEstimate(
        flops=int(4 * M * H * H4p),                    # two matmuls, 2*M*K*N each
        transcendentals=int(M * H4p),                  # one tanh per hidden4 element
        bytes_accessed=int(
            2 * M * H * x_bytes                        # x in + out
            + n_row_tiles * (w1_t.size * w_bytes + w2_t.size * w_bytes)
            + (b1.size + b2.size + ln_w.size + ln_b.size) * 4),
    )

    kernel = functools.partial(residual_mlp_kernel, compute_dtype=gelu_dtype)

    def _call(single_buffer_resident):
        # x / out blocks only change on the outer (row-tile) grid axis, so a
        # single buffer suffices -> frees VMEM for the larger row tile.
        extra = {"pipeline_mode": pl.Buffered(1)} if single_buffer_resident else {}
        in_specs = [
            pl.BlockSpec((tm, H), lambda i, j: (i, 0), **extra),   # x tile (resident over j)
            pl.BlockSpec((1, H), lambda i, j: (0, 0)),             # layernorm weight
            pl.BlockSpec((1, H), lambda i, j: (0, 0)),             # layernorm bias
            pl.BlockSpec((H, tn4), lambda i, j: (0, j)),           # W1 chunk (in, out)
            pl.BlockSpec((1, tn4), lambda i, j: (0, j)),           # b1 chunk
            pl.BlockSpec((tn4, H), lambda i, j: (j, 0)),           # W2 chunk (in, out)
            pl.BlockSpec((1, H), lambda i, j: (0, 0)),             # b2
        ]
        out_specs = pl.BlockSpec((tm, H), lambda i, j: (i, 0), **extra)
        return pl.pallas_call(
            kernel,
            out_shape=jax.ShapeDtypeStruct((M, H), x2d.dtype),
            grid_spec=pltpu.PrefetchScalarGridSpec(
                num_scalar_prefetch=0,
                grid=grid,
                in_specs=in_specs,
                out_specs=out_specs,
                scratch_shapes=[
                    pltpu.VMEM((tm, H), w_dtype),      # cached LayerNorm output
                    pltpu.VMEM((tm, H), jnp.float32),  # f32 accumulator (+res, +b2)
                ],
            ),
            compiler_params=pltpu.CompilerParams(
                dimension_semantics=("parallel", "arbitrary"),
                vmem_limit_bytes=int(vmem_limit_bytes),
            ),
            cost_estimate=cost,
        )(x2d, ln_w, ln_b, w1_t, b1, w2_t, b2)

    try:
        return _call(True)
    except Exception:
        # pl.Buffered / pipeline_mode unsupported on this jax build: fall back
        # to default double-buffering of x/out (identical results).
        return _call(False)


def residual_mlp_ref(x2d, ln_w, ln_b, w1_t, b1, w2_t, b2, gelu_dtype=None):
    """Pure-JAX reference mirroring the kernel's dtype choices."""
    if gelu_dtype is None:
        gelu_dtype = jnp.bfloat16 if w1_t.dtype == jnp.bfloat16 else jnp.float32
    x = x2d.astype(jnp.float32)
    mu = jnp.mean(x, axis=-1, keepdims=True)
    var = jnp.mean((x - mu) ** 2, axis=-1, keepdims=True)
    xn = (x - mu) * jax.lax.rsqrt(var + 1e-5) * ln_w.astype(jnp.float32) \
         + ln_b.astype(jnp.float32)
    xn = xn.astype(w1_t.dtype)
    h = jnp.dot(xn, w1_t, preferred_element_type=jnp.float32)
    h = h.astype(gelu_dtype) + b1.astype(gelu_dtype)
    c1 = 0.7978845608028654
    c2 = c1 * 0.044715
    g = (0.5 * h) * (1.0 + jnp.tanh(h * (c1 + c2 * (h * h))))
    y = jnp.dot(g.astype(w2_t.dtype), w2_t, preferred_element_type=jnp.float32) \
        + b2.astype(jnp.float32)
    return (x + y).astype(x2d.dtype)


if __name__ == "__main__":
    batch, seq, hidden = 2, 8, 32
    hidden4 = 4 * hidden

    key = jax.random.PRNGKey(0)
    kx, kw1, kb1, kw2, kb2 = jax.random.split(key, 5)

    # Input (PyTorch would see (batch, seq, hidden)).
    x = jax.random.normal(kx, (batch, seq, hidden), dtype=jnp.float32)

    # Parameters (LayerNorm init: weight=1, bias=0).
    ln_w = jnp.ones((1, hidden), dtype=jnp.float32)
    ln_b = jnp.zeros((1, hidden), dtype=jnp.float32)
    # PyTorch Linear stores (out, in); we pass the (in, out) transpose, cast to
    # bf16 so the MXU runs at its bf16 rate (f32 accumulation in-kernel).
    w1_t = (jax.random.normal(kw1, (hidden, hidden4), dtype=jnp.float32)
            * (1.0 / jnp.sqrt(hidden))).astype(jnp.bfloat16)
    b1 = jax.random.normal(kb1, (1, hidden4), dtype=jnp.float32) * 0.02
    w2_t = (jax.random.normal(kw2, (hidden4, hidden), dtype=jnp.float32)
            * (1.0 / jnp.sqrt(hidden4))).astype(jnp.bfloat16)
    b2 = jax.random.normal(kb2, (1, hidden), dtype=jnp.float32) * 0.02

    x2d = x.reshape(batch * seq, hidden)
    out2d = residual_mlp(x2d, ln_w, ln_b, w1_t, b1, w2_t, b2)
    out = out2d.reshape(batch, seq, hidden)
    jax.block_until_ready(out)

    # Sanity check against a pure-JAX reference using the same dtype choices.
    ref = residual_mlp_ref(x2d, ln_w, ln_b, w1_t, b1, w2_t, b2).reshape(batch, seq, hidden)
    assert jnp.allclose(out, ref, atol=2e-2, rtol=2e-2), "mismatch vs reference"

    print("KERNEL_OK")
</pallas_src>

<mosaic_0001>
module attributes {stable_mosaic.version = 11 : i64} {
  func.func @residual_mlp_kernel(%arg0: i32, %arg1: i32, %arg2: memref<16x32xf32, #tpu.memory_space<vmem>>, %arg3: memref<1x32xf32, #tpu.memory_space<vmem>>, %arg4: memref<1x32xf32, #tpu.memory_space<vmem>>, %arg5: memref<32x128xbf16, #tpu.memory_space<vmem>>, %arg6: memref<1x128xf32, #tpu.memory_space<vmem>>, %arg7: memref<128x32xbf16, #tpu.memory_space<vmem>>, %arg8: memref<1x32xf32, #tpu.memory_space<vmem>>, %arg9: memref<16x32xf32, #tpu.memory_space<vmem>>, %arg10: memref<16x32xbf16, #tpu.memory_space<vmem>>, %arg11: memref<16x32xf32, #tpu.memory_space<vmem>>) attributes {dimension_semantics = [#tpu.dimension_semantics<parallel>, #tpu.dimension_semantics<arbitrary>], iteration_bounds = array<i64: 1, 1>, scalar_prefetch = 0 : i64, scratch_operands = 2 : i64, tpu.core_type = #tpu.core_type<tc>, window_params = [{pipeline_mode = #tpu.pipeline_mode<synchronous>, transform_indices = @transform_0, window_bounds = array<i64: 16, 32>}, {pipeline_mode = #tpu.pipeline_mode<synchronous>, transform_indices = @transform_1, window_bounds = array<i64: 1, 32>}, {pipeline_mode = #tpu.pipeline_mode<synchronous>, transform_indices = @transform_2, window_bounds = array<i64: 1, 32>}, {transform_indices = @transform_3, window_bounds = array<i64: 32, 128>}, {transform_indices = @transform_4, window_bounds = array<i64: 1, 128>}, {transform_indices = @transform_5, window_bounds = array<i64: 128, 32>}, {pipeline_mode = #tpu.pipeline_mode<synchronous>, transform_indices = @transform_6, window_bounds = array<i64: 1, 32>}, {pipeline_mode = #tpu.pipeline_mode<synchronous>, transform_indices = @transform_7, window_bounds = array<i64: 16, 32>}]} {
    %c0_i32 = arith.constant 0 : i32
    %0 = arith.cmpi eq, %arg1, %c0_i32 : i32
    %1 = arith.extui %0 : i1 to i32
    %c0_i32_0 = arith.constant 0 : i32
    %2 = arith.cmpi ne, %1, %c0_i32_0 : i32
    scf.if %2 {
      %c0_19 = arith.constant 0 : index
      %c0_20 = arith.constant 0 : index
      %31 = vector.load %arg2[%c0_19, %c0_20] : memref<16x32xf32, #tpu.memory_space<vmem>>, vector<16x32xf32>
      %cst_21 = arith.constant dense<0.000000e+00> : vector<16xf32>
      %32 = vector.multi_reduction <add>, %31, %cst_21 [1] : vector<16x32xf32> to vector<16xf32>
      %33 = vector.shape_cast %32 : vector<16xf32> to vector<16x1xf32>
      %cst_22 = arith.constant 3.200000e+01 : f32
      %34 = vector.broadcast %cst_22 : f32 to vector<16x1xf32>
      %35 = arith.divf %33, %34 : vector<16x1xf32>
      %36 = vector.broadcast %35 : vector<16x1xf32> to vector<16x32xf32>
      %37 = arith.subf %31, %36 : vector<16x32xf32>
      %38 = arith.mulf %37, %37 : vector<16x32xf32>
      %cst_23 = arith.constant dense<0.000000e+00> : vector<16xf32>
      %39 = vector.multi_reduction <add>, %38, %cst_23 [1] : vector<16x32xf32> to vector<16xf32>
      %40 = vector.shape_cast %39 : vector<16xf32> to vector<16x1xf32>
      %cst_24 = arith.constant 3.200000e+01 : f32
      %41 = vector.broadcast %cst_24 : f32 to vector<16x1xf32>
      %42 = arith.divf %40, %41 : vector<16x1xf32>
      %cst_25 = arith.constant 9.99999974E-6 : f32
      %43 = vector.broadcast %cst_25 : f32 to vector<16x1xf32>
      %44 = arith.addf %42, %43 : vector<16x1xf32>
      %45 = math.rsqrt %44 : vector<16x1xf32>
      %46 = vector.broadcast %45 : vector<16x1xf32> to vector<16x32xf32>
      %47 = arith.mulf %37, %46 : vector<16x32xf32>
      %c0_26 = arith.constant 0 : index
      %c0_27 = arith.constant 0 : index
      %48 = vector.load %arg3[%c0_26, %c0_27] : memref<1x32xf32, #tpu.memory_space<vmem>>, vector<1x32xf32>
      %49 = vector.broadcast %48 : vector<1x32xf32> to vector<16x32xf32>
      %50 = arith.mulf %47, %49 : vector<16x32xf32>
      %c0_28 = arith.constant 0 : index
      %c0_29 = arith.constant 0 : index
      %51 = vector.load %arg4[%c0_28, %c0_29] : memref<1x32xf32, #tpu.memory_space<vmem>>, vector<1x32xf32>
      %52 = vector.broadcast %51 : vector<1x32xf32> to vector<16x32xf32>
      %53 = arith.addf %50, %52 : vector<16x32xf32>
      %54 = arith.truncf %53 : vector<16x32xf32> to vector<16x32xbf16>
      %c0_30 = arith.constant 0 : index
      %c0_31 = arith.constant 0 : index
      %55 = vector.load %arg10[%c0_30, %c0_31] : memref<16x32xbf16, #tpu.memory_space<vmem>>, vector<16x32xbf16>
      tpu.vector_store %arg10[%c0_30, %c0_31], %54 {strides = array<i32>} : memref<16x32xbf16, #tpu.memory_space<vmem>>, vector<16x32xbf16>,
      %c0_32 = arith.constant 0 : index
      %c0_33 = arith.constant 0 : index
      %56 = vector.load %arg8[%c0_32, %c0_33] : memref<1x32xf32, #tpu.memory_space<vmem>>, vector<1x32xf32>
      %57 = vector.broadcast %56 : vector<1x32xf32> to vector<16x32xf32>
      %58 = arith.addf %31, %57 : vector<16x32xf32>
      %c0_34 = arith.constant 0 : index
      %c0_35 = arith.constant 0 : index
      %59 = vector.load %arg11[%c0_34, %c0_35] : memref<16x32xf32, #tpu.memory_space<vmem>>, vector<16x32xf32>
      tpu.vector_store %arg11[%c0_34, %c0_35], %58 {strides = array<i32>} : memref<16x32xf32, #tpu.memory_space<vmem>>, vector<16x32xf32>,
    } else {
    }
    %c0 = arith.constant 0 : index
    %c0_1 = arith.constant 0 : index
    %3 = vector.load %arg10[%c0, %c0_1] : memref<16x32xbf16, #tpu.memory_space<vmem>>, vector<16x32xbf16>
    %c0_2 = arith.constant 0 : index
    %c0_3 = arith.constant 0 : index
    %4 = vector.load %arg5[%c0_2, %c0_3] : memref<32x128xbf16, #tpu.memory_space<vmem>>, vector<32x128xbf16>
    %cst = arith.constant dense<0.000000e+00> : vector<16x128xf32>
    %5 = tpu.matmul %3, %4, %cst {dimension_numbers = #tpu.dot_dimension_numbers<[1], [0], [0], [1], [0, 0, 1, 1], [], []>} : vector<16x32xbf16>, vector<32x128xbf16>, vector<16x128xf32> -> vector<16x128xf32>
    %6 = arith.truncf %5 : vector<16x128xf32> to vector<16x128xbf16>
    %c0_4 = arith.constant 0 : index
    %c0_5 = arith.constant 0 : index
    %7 = vector.load %arg6[%c0_4, %c0_5] : memref<1x128xf32, #tpu.memory_space<vmem>>, vector<1x128xf32>
    %8 = arith.truncf %7 : vector<1x128xf32> to vector<1x128xbf16>
    %9 = vector.broadcast %8 : vector<1x128xbf16> to vector<16x128xbf16>
    %10 = arith.addf %6, %9 : vector<16x128xbf16>
    %11 = arith.mulf %10, %10 : vector<16x128xbf16>
    %cst_6 = arith.constant 3.564450e-02 : bf16
    %12 = vector.broadcast %cst_6 : bf16 to vector<16x128xbf16>
    %13 = arith.mulf %12, %11 : vector<16x128xbf16>
    %cst_7 = arith.constant 7.968750e-01 : bf16
    %14 = vector.broadcast %cst_7 : bf16 to vector<16x128xbf16>
    %15 = arith.addf %14, %13 : vector<16x128xbf16>
    %16 = arith.mulf %10, %15 : vector<16x128xbf16>
    %17 = math.tanh %16 : vector<16x128xbf16>
    %cst_8 = arith.constant 5.000000e-01 : bf16
    %18 = vector.broadcast %cst_8 : bf16 to vector<16x128xbf16>
    %19 = arith.mulf %18, %10 : vector<16x128xbf16>
    %cst_9 = arith.constant 1.000000e+00 : bf16
    %20 = vector.broadcast %cst_9 : bf16 to vector<16x128xbf16>
    %21 = arith.addf %20, %17 : vector<16x128xbf16>
    %22 = arith.mulf %19, %21 : vector<16x128xbf16>
    %c0_10 = arith.constant 0 : index
    %c0_11 = arith.constant 0 : index
    %23 = vector.load %arg11[%c0_10, %c0_11] : memref<16x32xf32, #tpu.memory_space<vmem>>, vector<16x32xf32>
    %c0_12 = arith.constant 0 : index
    %c0_13 = arith.constant 0 : index
    %24 = vector.load %arg7[%c0_12, %c0_13] : memref<128x32xbf16, #tpu.memory_space<vmem>>, vector<128x32xbf16>
    %cst_14 = arith.constant dense<0.000000e+00> : vector<16x32xf32>
    %25 = tpu.matmul %22, %24, %cst_14 {dimension_numbers = #tpu.dot_dimension_numbers<[1], [0], [0], [1], [0, 0, 1, 1], [], []>} : vector<16x128xbf16>, vector<128x32xbf16>, vector<16x32xf32> -> vector<16x32xf32>
    %26 = arith.addf %23, %25 : vector<16x32xf32>
    %c0_15 = arith.constant 0 : index
    %c0_16 = arith.constant 0 : index
    %27 = vector.load %arg11[%c0_15, %c0_16] : memref<16x32xf32, #tpu.memory_space<vmem>>, vector<16x32xf32>
    tpu.vector_store %arg11[%c0_15, %c0_16], %26 {strides = array<i32>} : memref<16x32xf32, #tpu.memory_space<vmem>>, vector<16x32xf32>,
    %c0_i32_17 = arith.constant 0 : i32
    %28 = arith.cmpi eq, %arg1, %c0_i32_17 : i32
    %29 = arith.extui %28 : i1 to i32
    %c0_i32_18 = arith.constant 0 : i32
    %30 = arith.cmpi ne, %29, %c0_i32_18 : i32
    scf.if %30 {
      %c0_19 = arith.constant 0 : index
      %c0_20 = arith.constant 0 : index
      %31 = vector.load %arg11[%c0_19, %c0_20] : memref<16x32xf32, #tpu.memory_space<vmem>>, vector<16x32xf32>
      %c0_21 = arith.constant 0 : index
      %c0_22 = arith.constant 0 : index
      %32 = vector.load %arg9[%c0_21, %c0_22] : memref<16x32xf32, #tpu.memory_space<vmem>>, vector<16x32xf32>
      tpu.vector_store %arg9[%c0_21, %c0_22], %31 {strides = array<i32>} : memref<16x32xf32, #tpu.memory_space<vmem>>, vector<16x32xf32>,
    } else {
    }
    return
  }
  func.func @transform_0(%arg0: i32, %arg1: i32) -> (i32, i32) {
    %c0_i32 = arith.constant 0 : i32
    %c0_i32_0 = arith.constant 0 : i32
    return %arg0, %c0_i32 : i32, i32
  }
  func.func @transform_1(%arg0: i32, %arg1: i32) -> (i32, i32) {
    %c0_i32 = arith.constant 0 : i32
    %c0_i32_0 = arith.constant 0 : i32
    %c0_i32_1 = arith.constant 0 : i32
    return %c0_i32, %c0_i32_0 : i32, i32
  }
  func.func @transform_2(%arg0: i32, %arg1: i32) -> (i32, i32) {
    %c0_i32 = arith.constant 0 : i32
    %c0_i32_0 = arith.constant 0 : i32
    %c0_i32_1 = arith.constant 0 : i32
    return %c0_i32, %c0_i32_0 : i32, i32
  }
  func.func @transform_3(%arg0: i32, %arg1: i32) -> (i32, i32) {
    %c0_i32 = arith.constant 0 : i32
    %c0_i32_0 = arith.constant 0 : i32
    return %c0_i32, %arg1 : i32, i32
  }
  func.func @transform_4(%arg0: i32, %arg1: i32) -> (i32, i32) {
    %c0_i32 = arith.constant 0 : i32
    %c0_i32_0 = arith.constant 0 : i32
    return %c0_i32, %arg1 : i32, i32
  }
  func.func @transform_5(%arg0: i32, %arg1: i32) -> (i32, i32) {
    %c0_i32 = arith.constant 0 : i32
    %c0_i32_0 = arith.constant 0 : i32
    return %arg1, %c0_i32 : i32, i32
  }
  func.func @transform_6(%arg0: i32, %arg1: i32) -> (i32, i32) {
    %c0_i32 = arith.constant 0 : i32
    %c0_i32_0 = arith.constant 0 : i32
    %c0_i32_1 = arith.constant 0 : i32
    return %c0_i32, %c0_i32_0 : i32, i32
  }
  func.func @transform_7(%arg0: i32, %arg1: i32) -> (i32, i32) {
    %c0_i32 = arith.constant 0 : i32
    %c0_i32_0 = arith.constant 0 : i32
    return %arg0, %c0_i32 : i32, i32
  }
}

module attributes {stable_mosaic.version = 11 : i64} {
  func.func @residual_mlp_kernel(%arg0: i32, %arg1: i32, %arg2: memref<16x32xf32, #tpu.memory_space<vmem>>, %arg3: memref<1x32xf32, #tpu.memory_space<vmem>>, %arg4: memref<1x32xf32, #tpu.memory_space<vmem>>, %arg5: memref<32x128xbf16, #tpu.memory_space<vmem>>, %arg6: memref<1x128xf32, #tpu.memory_space<vmem>>, %arg7: memref<128x32xbf16, #tpu.memory_space<vmem>>, %arg8: memref<1x32xf32, #tpu.memory_space<vmem>>, %arg9: memref<16x32xf32, #tpu.memory_space<vmem>>, %arg10: memref<16x32xbf16, #tpu.memory_space<vmem>>, %arg11: memref<16x32xf32, #tpu.memory_space<vmem>>) attributes {dimension_semantics = [#tpu.dimension_semantics<parallel>, #tpu.dimension_semantics<arbitrary>], iteration_bounds = array<i64: 1, 1>, scalar_prefetch = 0 : i64, scratch_operands = 2 : i64, tpu.core_type = #tpu.core_type<tc>, window_params = [{transform_indices = @transform_0, window_bounds = array<i64: 16, 32>}, {pipeline_mode = #tpu.pipeline_mode<synchronous>, transform_indices = @transform_1, window_bounds = array<i64: 1, 32>}, {pipeline_mode = #tpu.pipeline_mode<synchronous>, transform_indices = @transform_2, window_bounds = array<i64: 1, 32>}, {transform_indices = @transform_3, window_bounds = array<i64: 32, 128>}, {transform_indices = @transform_4, window_bounds = array<i64: 1, 128>}, {transform_indices = @transform_5, window_bounds = array<i64: 128, 32>}, {pipeline_mode = #tpu.pipeline_mode<synchronous>, transform_indices = @transform_6, window_bounds = array<i64: 1, 32>}, {transform_indices = @transform_7, window_bounds = array<i64: 16, 32>}]} {
    %c0_i32 = arith.constant 0 : i32
    %0 = arith.cmpi eq, %arg1, %c0_i32 : i32
    %1 = arith.extui %0 : i1 to i32
    %c0_i32_0 = arith.constant 0 : i32
    %2 = arith.cmpi ne, %1, %c0_i32_0 : i32
    scf.if %2 {
      %c0_19 = arith.constant 0 : index
      %c0_20 = arith.constant 0 : index
      %31 = vector.load %arg2[%c0_19, %c0_20] : memref<16x32xf32, #tpu.memory_space<vmem>>, vector<16x32xf32>
      %cst_21 = arith.constant dense<0.000000e+00> : vector<16xf32>
      %32 = vector.multi_reduction <add>, %31, %cst_21 [1] : vector<16x32xf32> to vector<16xf32>
      %33 = vector.shape_cast %32 : vector<16xf32> to vector<16x1xf32>
      %cst_22 = arith.constant 3.200000e+01 : f32
      %34 = vector.broadcast %cst_22 : f32 to vector<16x1xf32>
      %35 = arith.divf %33, %34 : vector<16x1xf32>
      %36 = vector.broadcast %35 : vector<16x1xf32> to vector<16x32xf32>
      %37 = arith.subf %31, %36 : vector<16x32xf32>
      %38 = arith.mulf %37, %37 : vector<16x32xf32>
      %cst_23 = arith.constant dense<0.000000e+00> : vector<16xf32>
      %39 = vector.multi_reduction <add>, %38, %cst_23 [1] : vector<16x32xf32> to vector<16xf32>
      %40 = vector.shape_cast %39 : vector<16xf32> to vector<16x1xf32>
      %cst_24 = arith.constant 3.200000e+01 : f32
      %41 = vector.broadcast %cst_24 : f32 to vector<16x1xf32>
      %42 = arith.divf %40, %41 : vector<16x1xf32>
      %cst_25 = arith.constant 9.99999974E-6 : f32
      %43 = vector.broadcast %cst_25 : f32 to vector<16x1xf32>
      %44 = arith.addf %42, %43 : vector<16x1xf32>
      %45 = math.rsqrt %44 : vector<16x1xf32>
      %46 = vector.broadcast %45 : vector<16x1xf32> to vector<16x32xf32>
      %47 = arith.mulf %37, %46 : vector<16x32xf32>
      %c0_26 = arith.constant 0 : index
      %c0_27 = arith.constant 0 : index
      %48 = vector.load %arg3[%c0_26, %c0_27] : memref<1x32xf32, #tpu.memory_space<vmem>>, vector<1x32xf32>
      %49 = vector.broadcast %48 : vector<1x32xf32> to vector<16x32xf32>
      %50 = arith.mulf %47, %49 : vector<16x32xf32>
      %c0_28 = arith.constant 0 : index
      %c0_29 = arith.constant 0 : index
      %51 = vector.load %arg4[%c0_28, %c0_29] : memref<1x32xf32, #tpu.memory_space<vmem>>, vector<1x32xf32>
      %52 = vector.broadcast %51 : vector<1x32xf32> to vector<16x32xf32>
      %53 = arith.addf %50, %52 : vector<16x32xf32>
      %54 = arith.truncf %53 : vector<16x32xf32> to vector<16x32xbf16>
      %c0_30 = arith.constant 0 : index
      %c0_31 = arith.constant 0 : index
      %55 = vector.load %arg10[%c0_30, %c0_31] : memref<16x32xbf16, #tpu.memory_space<vmem>>, vector<16x32xbf16>
      tpu.vector_store %arg10[%c0_30, %c0_31], %54 {strides = array<i32>} : memref<16x32xbf16, #tpu.memory_space<vmem>>, vector<16x32xbf16>,
      %c0_32 = arith.constant 0 : index
      %c0_33 = arith.constant 0 : index
      %56 = vector.load %arg8[%c0_32, %c0_33] : memref<1x32xf32, #tpu.memory_space<vmem>>, vector<1x32xf32>
      %57 = vector.broadcast %56 : vector<1x32xf32> to vector<16x32xf32>
      %58 = arith.addf %31, %57 : vector<16x32xf32>
      %c0_34 = arith.constant 0 : index
      %c0_35 = arith.constant 0 : index
      %59 = vector.load %arg11[%c0_34, %c0_35] : memref<16x32xf32, #tpu.memory_space<vmem>>, vector<16x32xf32>
      tpu.vector_store %arg11[%c0_34, %c0_35], %58 {strides = array<i32>} : memref<16x32xf32, #tpu.memory_space<vmem>>, vector<16x32xf32>,
    } else {
    }
    %c0 = arith.constant 0 : index
    %c0_1 = arith.constant 0 : index
    %3 = vector.load %arg10[%c0, %c0_1] : memref<16x32xbf16, #tpu.memory_space<vmem>>, vector<16x32xbf16>
    %c0_2 = arith.constant 0 : index
    %c0_3 = arith.constant 0 : index
    %4 = vector.load %arg5[%c0_2, %c0_3] : memref<32x128xbf16, #tpu.memory_space<vmem>>, vector<32x128xbf16>
    %cst = arith.constant dense<0.000000e+00> : vector<16x128xf32>
    %5 = tpu.matmul %3, %4, %cst {dimension_numbers = #tpu.dot_dimension_numbers<[1], [0], [0], [1], [0, 0, 1, 1], [], []>} : vector<16x32xbf16>, vector<32x128xbf16>, vector<16x128xf32> -> vector<16x128xf32>
    %6 = arith.truncf %5 : vector<16x128xf32> to vector<16x128xbf16>
    %c0_4 = arith.constant 0 : index
    %c0_5 = arith.constant 0 : index
    %7 = vector.load %arg6[%c0_4, %c0_5] : memref<1x128xf32, #tpu.memory_space<vmem>>, vector<1x128xf32>
    %8 = arith.truncf %7 : vector<1x128xf32> to vector<1x128xbf16>
    %9 = vector.broadcast %8 : vector<1x128xbf16> to vector<16x128xbf16>
    %10 = arith.addf %6, %9 : vector<16x128xbf16>
    %11 = arith.mulf %10, %10 : vector<16x128xbf16>
    %cst_6 = arith.constant 3.564450e-02 : bf16
    %12 = vector.broadcast %cst_6 : bf16 to vector<16x128xbf16>
    %13 = arith.mulf %12, %11 : vector<16x128xbf16>
    %cst_7 = arith.constant 7.968750e-01 : bf16
    %14 = vector.broadcast %cst_7 : bf16 to vector<16x128xbf16>
    %15 = arith.addf %14, %13 : vector<16x128xbf16>
    %16 = arith.mulf %10, %15 : vector<16x128xbf16>
    %17 = math.tanh %16 : vector<16x128xbf16>
    %cst_8 = arith.constant 5.000000e-01 : bf16
    %18 = vector.broadcast %cst_8 : bf16 to vector<16x128xbf16>
    %19 = arith.mulf %18, %10 : vector<16x128xbf16>
    %cst_9 = arith.constant 1.000000e+00 : bf16
    %20 = vector.broadcast %cst_9 : bf16 to vector<16x128xbf16>
    %21 = arith.addf %20, %17 : vector<16x128xbf16>
    %22 = arith.mulf %19, %21 : vector<16x128xbf16>
    %c0_10 = arith.constant 0 : index
    %c0_11 = arith.constant 0 : index
    %23 = vector.load %arg11[%c0_10, %c0_11] : memref<16x32xf32, #tpu.memory_space<vmem>>, vector<16x32xf32>
    %c0_12 = arith.constant 0 : index
    %c0_13 = arith.constant 0 : index
    %24 = vector.load %arg7[%c0_12, %c0_13] : memref<128x32xbf16, #tpu.memory_space<vmem>>, vector<128x32xbf16>
    %cst_14 = arith.constant dense<0.000000e+00> : vector<16x32xf32>
    %25 = tpu.matmul %22, %24, %cst_14 {dimension_numbers = #tpu.dot_dimension_numbers<[1], [0], [0], [1], [0, 0, 1, 1], [], []>} : vector<16x128xbf16>, vector<128x32xbf16>, vector<16x32xf32> -> vector<16x32xf32>
    %26 = arith.addf %23, %25 : vector<16x32xf32>
    %c0_15 = arith.constant 0 : index
    %c0_16 = arith.constant 0 : index
    %27 = vector.load %arg11[%c0_15, %c0_16] : memref<16x32xf32, #tpu.memory_space<vmem>>, vector<16x32xf32>
    tpu.vector_store %arg11[%c0_15, %c0_16], %26 {strides = array<i32>} : memref<16x32xf32, #tpu.memory_space<vmem>>, vector<16x32xf32>,
    %c0_i32_17 = arith.constant 0 : i32
    %28 = arith.cmpi eq, %arg1, %c0_i32_17 : i32
    %29 = arith.extui %28 : i1 to i32
    %c0_i32_18 = arith.constant 0 : i32
    %30 = arith.cmpi ne, %29, %c0_i32_18 : i32
    scf.if %30 {
      %c0_19 = arith.constant 0 : index
      %c0_20 = arith.constant 0 : index
      %31 = vector.load %arg11[%c0_19, %c0_20] : memref<16x32xf32, #tpu.memory_space<vmem>>, vector<16x32xf32>
      %c0_21 = arith.constant 0 : index
      %c0_22 = arith.constant 0 : index
      %32 = vector.load %arg9[%c0_21, %c0_22] : memref<16x32xf32, #tpu.memory_space<vmem>>, vector<16x32xf32>
      tpu.vector_store %arg9[%c0_21, %c0_22], %31 {strides = array<i32>} : memref<16x32xf32, #tpu.memory_space<vmem>>, vector<16x32xf32>,
    } else {
    }
    return
  }
  func.func @transform_0(%arg0: i32, %arg1: i32) -> (i32, i32) {
    %c0_i32 = arith.constant 0 : i32
    %c0_i32_0 = arith.constant 0 : i32
    return %arg0, %c0_i32 : i32, i32
  }
  func.func @transform_1(%arg0: i32, %arg1: i32) -> (i32, i32) {
    %c0_i32 = arith.constant 0 : i32
    %c0_i32_0 = arith.constant 0 : i32
    %c0_i32_1 = arith.constant 0 : i32
    return %c0_i32, %c0_i32_0 : i32, i32
  }
  func.func @transform_2(%arg0: i32, %arg1: i32) -> (i32, i32) {
    %c0_i32 = arith.constant 0 : i32
    %c0_i32_0 = arith.constant 0 : i32
    %c0_i32_1 = arith.constant 0 : i32
    return %c0_i32, %c0_i32_0 : i32, i32
  }
  func.func @transform_3(%arg0: i32, %arg1: i32) -> (i32, i32) {
    %c0_i32 = arith.constant 0 : i32
    %c0_i32_0 = arith.constant 0 : i32
    return %c0_i32, %arg1 : i32, i32
  }
  func.func @transform_4(%arg0: i32, %arg1: i32) -> (i32, i32) {
    %c0_i32 = arith.constant 0 : i32
    %c0_i32_0 = arith.constant 0 : i32
    return %c0_i32, %arg1 : i32, i32
  }
  func.func @transform_5(%arg0: i32, %arg1: i32) -> (i32, i32) {
    %c0_i32 = arith.constant 0 : i32
    %c0_i32_0 = arith.constant 0 : i32
    return %arg1, %c0_i32 : i32, i32
  }
  func.func @transform_6(%arg0: i32, %arg1: i32) -> (i32, i32) {
    %c0_i32 = arith.constant 0 : i32
    %c0_i32_0 = arith.constant 0 : i32
    %c0_i32_1 = arith.constant 0 : i32
    return %c0_i32, %c0_i32_0 : i32, i32
  }
  func.func @transform_7(%arg0: i32, %arg1: i32) -> (i32, i32) {
    %c0_i32 = arith.constant 0 : i32
    %c0_i32_0 = arith.constant 0 : i32
    return %arg0, %c0_i32 : i32, i32
  }
}

</mosaic_0001>

<bundles_post_ra>
// kernel: tpu_custom_call.1
= control target key start
LH: loop header
LB: loop body
LE: loop exit
PB: predicated region body
PF: predicated region fallthrough
CT: control target
= control target key end

     0   :  { %12 = vsyncpa [#allocation5], 0  ;;  %s855_s0 = inlined_call_operand.hbm [shape: f32[16,32], index: 0, kind: input, shape index: {}]   ;;  %s856_s1 = inlined_call_operand.hbm [shape: f32[1,32], index: 1, kind: input, shape index: {}]   ;;  %s857_s2 = inlined_call_operand.hbm [shape: f32[1,32], index: 2, kind: input, shape index: {}]   ;;  %s858_s3 = inlined_call_operand.hbm [shape: bf16[32,128], index: 3, kind: input, shape index: {}]   ;;  %s859_s4 = inlined_call_operand.hbm [shape: f32[1,128], index: 4, kind: input, shape index: {}]   ;;  %s860_s5 = inlined_call_operand.hbm [shape: bf16[128,32], index: 5, kind: input, shape index: {}]   ;;  %s861_s6 = inlined_call_operand.hbm [shape: f32[1,32], index: 6, kind: input, shape index: {}]   ;;  %s862_s7 = inlined_call_operand.hbm [shape: f32[16,32], index: 7, kind: output, shape index: {}]  }
   0x1   :  { %13 = vsyncpa [#allocation8], 0 }
   0x2   :  { %14 = vsyncpa [#allocation11], 0 }
   0x3   :  { %15 = vsyncpa [#allocation14], 0 }
   0x4   :  { %16 = vsyncpa [#allocation6], 0  ;;  %s673_s24 = smov [#allocation7]   ;;  %s674_s26 = smov [#allocation10]  }
   0x5   :  { %s35_s25 = sshll.u32 %s673_s24, 4  ;;  %s54_s27 = sshll.u32 %s674_s26, 4  ;;  %s36_s25 = int_to_ptr.vmem [resolvable:$true] %s35_s25  ;;  %s727_s27 = int_to_ptr.vmem [resolvable:$true] %s54_s27 }
   0x6   :  { %s487_s30 = scalar_lea.hbm %s856_s1, 16 }
   0x7   :  { %p488_p0 = scmp.ne.s32.totalorder %s856_s1, %s487_s30  ;;  %p491_p1 = scmp.lt.u32.totalorder %s487_s30, %s856_s1 }
   0x9   :  { %p493_p2 = pnand %p491_p1, %p488_p0 }
   0xb   :  { %496 = shalt.err (!%p493_p2)
}
   0xc   :  { %s497_s12 = scalar_lea.vmem %s36_s25, 16  ;;  %s501_s13 = scalar_lea.vmem %s36_s25, 32 }
   0xd   :  { %p498_p3 = scmp.ne.s32.totalorder %s36_s25, %s497_s12  ;;  %p502_p4 = scmp.lt.s32.totalorder %s36_s25, %s36_s25 }
   0xe   :  { %p503_p5 = scmp.lt.s32.totalorder %s501_s13, %s497_s12 }
  0x10   :  { %p504_p6 = por %p503_p5, %p502_p4 }
  0x12   :  { %p505_p7 = pnand %p504_p6, %p498_p3 }
  0x14   :  { %508 = shalt.err (!%p505_p7)
}
  0x15   :  { %38 = dma.hbm_to_vmem [thread:$0]  %s856_s1, 16, %s36_s25, [#allocation8]  }
  0x16   :  { %s509_s18 = scalar_lea.hbm %s858_s3, 256 }
  0x17   :  { %p510_p8 = scmp.ne.s32.totalorder %s858_s3, %s509_s18  ;;  %p513_p9 = scmp.lt.u32.totalorder %s509_s18, %s858_s3 }
  0x19   :  { %p515_p10 = pnand %p513_p9, %p510_p8 }
  0x1b   :  { %518 = shalt.err (!%p515_p10)
}
  0x1c   :  { %s519_s23 = scalar_lea.vmem %s727_s27, 256  ;;  %p524_p12 = scmp.lt.s32.totalorder %s727_s27, %s727_s27 }
  0x1d   :  { %p520_p11 = scmp.ne.s32.totalorder %s727_s27, %s519_s23  ;;  %p525_p13 = scmp.lt.s32.totalorder %s519_s23, %s519_s23 }
  0x1f   :  { %p526_p0 = por %p525_p13, %p524_p12 }
  0x21   :  { %p527_p1 = pnand %p526_p0, %p520_p11 }
  0x23   :  { %530 = shalt.err (!%p527_p1)
}
  0x24   :  { %s675_s1 = smov 64   ;;  %s676_s24 = smov 4  }
  0x25   :  { %60 = dma.hbm_to_vmem [thread:$0]  %s858_s3, 256, %s727_s27, [#allocation11], %s675_s1, %s675_s1, %s676_s24  }
  0x26   :  { %s677_s28 = smov [#allocation13]   ;;  %s678_s30 = smov [#allocation4]  }
  0x27   :  { %s76_s29 = sshll.u32 %s677_s28, 4  ;;  %s22_s8 = sshll.u32 %s678_s30, 4  ;;  %s77_s29 = int_to_ptr.vmem [resolvable:$true] %s76_s29  ;;  %s758_s8 = int_to_ptr.vmem [resolvable:$true] %s22_s8 }
  0x28   :  { %s531_s11 = scalar_lea.hbm %s860_s5, 1024 }
  0x29   :  { %p532_p2 = scmp.ne.s32.totalorder %s860_s5, %s531_s11  ;;  %p535_p3 = scmp.lt.u32.totalorder %s531_s11, %s860_s5 }
  0x2b   :  { %p537_p4 = pnand %p535_p3, %p532_p2 }
  0x2d   :  { %540 = shalt.err (!%p537_p4)
}
  0x2e   :  { %s541_s3 = scalar_lea.vmem %s77_s29, 1024  ;;  %p546_p6 = scmp.lt.s32.totalorder %s77_s29, %s77_s29 }
  0x2f   :  { %p542_p5 = scmp.ne.s32.totalorder %s77_s29, %s541_s3  ;;  %p547_p7 = scmp.lt.s32.totalorder %s541_s3, %s541_s3 }
  0x31   :  { %p548_p8 = por %p547_p7, %p546_p6 }
  0x33   :  { %p549_p9 = pnand %p548_p8, %p542_p5 }
  0x35   :  { %552 = shalt.err (!%p549_p9)
}
  0x36   :  { %82 = dma.hbm_to_vmem [thread:$0]  %s860_s5, 1024, %s77_s29, [#allocation14], %s675_s1, %s675_s1, %s676_s24  }
  0x37   :  { %s553_s19 = scalar_lea.hbm %s855_s0, 256 }
  0x38   :  { %p554_p10 = scmp.ne.s32.totalorder %s855_s0, %s553_s19  ;;  %p557_p11 = scmp.lt.u32.totalorder %s553_s19, %s855_s0 }
  0x3a   :  { %p559_p12 = pnand %p557_p11, %p554_p10 }
  0x3c   :  { %562 = shalt.err (!%p559_p12)
}
  0x3d   :  { %s563_s25 = scalar_lea.vmem %s758_s8, 256  ;;  %p568_p0 = scmp.lt.s32.totalorder %s758_s8, %s758_s8 }
  0x3e   :  { %p564_p13 = scmp.ne.s32.totalorder %s758_s8, %s563_s25  ;;  %p569_p1 = scmp.lt.s32.totalorder %s563_s25, %s563_s25 }
  0x40   :  { %p570_p2 = por %p569_p1, %p568_p0 }
  0x42   :  { %p571_p3 = pnand %p570_p2, %p564_p13 }
  0x44   :  { %574 = shalt.err (!%p571_p3)
}
  0x45   :  { %s679_s5 = smov 128   ;;  %s680_s1 = smov 8  }
  0x46   :  { %28 = dma.hbm_to_vmem [thread:$0]  %s855_s0, 256, %s758_s8, [#allocation5], %s679_s5, %s679_s5, %s680_s1  }
  0x47   :  { %s681_s28 = smov [#allocation9]   ;;  %s682_s30 = smov [#allocation12]  }
  0x48   :  { %s45_s29 = sshll.u32 %s681_s28, 4  ;;  %s67_s9 = sshll.u32 %s682_s30, 4  ;;  %s46_s29 = int_to_ptr.vmem [resolvable:$true] %s45_s29  ;;  %s68_s9 = int_to_ptr.vmem [resolvable:$true] %s67_s9 }
  0x49   :  { %s575_s12 = scalar_lea.hbm %s857_s2, 16 }
  0x4a   :  { %p576_p4 = scmp.ne.s32.totalorder %s857_s2, %s575_s12  ;;  %p579_p5 = scmp.lt.u32.totalorder %s575_s12, %s857_s2 }
  0x4c   :  { %p581_p6 = pnand %p579_p5, %p576_p4 }
  0x4e   :  { %584 = shalt.err (!%p581_p6)
}
  0x4f   :  { %s585_s0 = scalar_lea.vmem %s46_s29, 16  ;;  %s589_s8 = scalar_lea.vmem %s46_s29, 32 }
  0x50   :  { %p586_p7 = scmp.ne.s32.totalorder %s46_s29, %s585_s0  ;;  %p590_p8 = scmp.lt.s32.totalorder %s46_s29, %s46_s29 }
  0x51   :  { %p591_p9 = scmp.lt.s32.totalorder %s589_s8, %s585_s0 }
  0x53   :  { %p592_p10 = por %p591_p9, %p590_p8 }
  0x55   :  { %p593_p11 = pnand %p592_p10, %p586_p7 }
  0x57   :  { %596 = shalt.err (!%p593_p11)
}
  0x58   :  { %48 = dma.hbm_to_vmem [thread:$0]  %s857_s2, 16, %s46_s29, [#allocation8]  }
  0x59   :  { %s597_s19 = scalar_lea.hbm %s859_s4, 16 }
  0x5a   :  { %p598_p12 = scmp.ne.s32.totalorder %s859_s4, %s597_s19  ;;  %p601_p13 = scmp.lt.u32.totalorder %s597_s19, %s859_s4 }
  0x5c   :  { %p603_p0 = pnand %p601_p13, %p598_p12 }
  0x5e   :  { %606 = shalt.err (!%p603_p0)
}
  0x5f   :  { %s607_s25 = scalar_lea.vmem %s68_s9, 16  ;;  %s611_s24 = scalar_lea.vmem %s68_s9, 32 }
  0x60   :  { %p608_p1 = scmp.ne.s32.totalorder %s68_s9, %s607_s25  ;;  %p612_p2 = scmp.lt.s32.totalorder %s68_s9, %s68_s9 }
  0x61   :  { %p613_p3 = scmp.lt.s32.totalorder %s611_s24, %s607_s25 }
  0x63   :  { %p614_p4 = por %p613_p3, %p612_p2 }
  0x65   :  { %p615_p5 = pnand %p614_p4, %p608_p1 }
  0x67   :  { %618 = shalt.err (!%p615_p5)
}
  0x68   :  { %70 = dma.hbm_to_vmem [thread:$0]  %s859_s4, 16, %s68_s9, [#allocation11]  }
  0x69   :  { %s683_s28 = smov [#allocation15]   ;;  %s619_s11 = scalar_lea.hbm %s861_s6, 16 }
  0x6a   :  { %s89_s29 = sshll.u32 %s683_s28, 4  ;;  %p620_p6 = scmp.ne.s32.totalorder %s861_s6, %s619_s11  ;;  %s90_s29 = int_to_ptr.vmem [resolvable:$true] %s89_s29 }
  0x6b   :  { %p623_p7 = scmp.lt.u32.totalorder %s619_s11, %s861_s6 }
  0x6d   :  { %p625_p8 = pnand %p623_p7, %p620_p6 }
  0x6f   :  { %628 = shalt.err (!%p625_p8)
}
  0x70   :  { %s629_s3 = scalar_lea.vmem %s90_s29, 16  ;;  %s633_s4 = scalar_lea.vmem %s90_s29, 32 }
  0x71   :  { %p630_p9 = scmp.ne.s32.totalorder %s90_s29, %s629_s3  ;;  %p634_p10 = scmp.lt.s32.totalorder %s90_s29, %s90_s29 }
  0x72   :  { %p635_p11 = scmp.lt.s32.totalorder %s633_s4, %s629_s3 }
  0x74   :  { %p636_p12 = por %p635_p11, %p634_p10 }
  0x76   :  { %p637_p13 = pnand %p636_p12, %p630_p9 }
  0x78   :  { %640 = shalt.err (!%p637_p13)
}
  0x79   :  { %92 = dma.hbm_to_vmem [thread:$0]  %s861_s6, 16, %s90_s29, [#allocation14]  }
  0x7a   :  { %663 = dma.done.wait [#allocation5], 256  }
  0x7b   :  { %664 = vsyncadd [#allocation5], 4294967040 }
  0x7c   :  { %665 = dma.done.wait [#allocation8], 32  }
  0x7d   :  { %666 = vsyncadd [#allocation8], 4294967264 }
  0x7e   :  { %667 = dma.done.wait [#allocation11], 272  }
  0x7f   :  { %668 = vsyncadd [#allocation11], 4294967024 }
  0x80   :  { %669 = dma.done.wait [#allocation14], 1040  }
  0x81   :  { %670 = vsyncadd [#allocation14], 4294966256  ;;  %vm125_vm0 = vcmask 261120   ;;  %v123_v0 = vld [vmem:[#allocation4] sm:$0xff]  ;;  %v124_v2 = vld [vmem:[#allocation4 + $0x8] sm:$0xff]  ;;  %v684_v18 = vmov 0.0   ;;  %v252_v46 = vlaneseq }
  0x82   :  { %v405_v1 = vld [vmem:[#allocation15] ss:$0 sm:$0xff]  ;;  %v126_v3 = vsel %vm125_vm0, %v123_v0, 0.0  ;;  %v129_v5 = vsel %vm125_vm0, %v124_v2, 0.0  ;;  %v471_v17 = vld [vmem:[#allocation10] sm:$0xff]   ;;  %429 = vmatprep.subr.bf16.mxu0 %v684_v18  ;;  %437 = vmatprep.subr.bf16.mxu1 %v684_v18  ;;  %v472_v19 = vld [vmem:[#allocation10 + $0x8] sm:$0xff]  }
  0x83   :  { %v180_v4 = vadd.f32 %v405_v1, %v123_v0  ;;  %v181_v6 = vadd.f32 %v405_v1, %v124_v2  ;;  %127 = vadd.xlane.f32.xlu0 %v126_v3  ;;  %430 = vmatpush3.bf16.msra.mxu0 %v471_v17  ;;  %vm685_vm1 = vmmov 0   ;;  %v403_v28 = vld [vmem:[#allocation7] ss:$0 sm:$0xff]  ;;  %v404_v32 = vld [vmem:[#allocation9] ss:$0 sm:$0xff]  ;;  %v473_v38 = vld [vmem:[#allocation13] sm:$0xff]  }
  0x84   :  { %433 = vmatprep.mubr.msk.bf16.mxu0 %vm685_vm1, %v684_v18  ;;  %431 = vmatprep.subr.bf16.mxu0 %v684_v18  ;;  %v474_v39 = vld [vmem:[#allocation13 + $0x8] sm:$0xff]   ;;  %v475_v40 = vld [vmem:[#allocation13 + $0x10] sm:$0xff]   ;;  %v476_v41 = vld [vmem:[#allocation13 + $0x18] sm:$0xff]   ;;  %v253_v49 = vshrl.u32 %v252_v46, 7  ;;  %s686_s6 = smov [#allocation16]  }
  0x85   :  { %182 = vst.msk [vmem:[#allocation3] sm:$0xff] %vm125_vm0, %v180_v4  ;;  %183 = vst.msk [vmem:[#allocation3 + $0x8] sm:$0xff] %vm125_vm0, %v181_v6  ;;  %453 = vmatprep.mubr.msk.bf16.mxu1 %vm685_vm1, %v684_v18  ;;  %438 = vmatpush3.bf16.msra.mxu1 %v473_v38  ;;  %v477_v42 = vld [vmem:[#allocation13 + $0x20] sm:$0xff]   ;;  %v478_v43 = vld [vmem:[#allocation13 + $0x28] sm:$0xff]   ;;  %s388_s8 = sshll.u32 %s686_s6, 4  ;;  %s389_s8 = int_to_ptr.vmem [resolvable:$true] %s388_s8 }
  0x86   :  { %439 = vmatprep.subr.bf16.mxu1 %v684_v18  ;;  %v479_v44 = vld [vmem:[#allocation13 + $0x30] sm:$0xff]   ;;  %v480_v45 = vld [vmem:[#allocation13 + $0x38] sm:$0xff]   ;;  %v254_v51 = vsub.s32 0, %v253_v49  ;;  %s641_s27 = scalar_lea.vmem %s389_s8, 256  ;;  %p646_p1 = scmp.lt.s32.totalorder %s389_s8, %s389_s8 }
  0x87   :  { %130 = vadd.xlane.f32.xlu0 %v129_v5  ;;  %432 = vmatpush3.bf16.msra.mxu0 %v472_v19  ;;  %v247_v47 = vld [vmem:[#allocation12] sm:$0x1]  ;;  %p642_p0 = scmp.ne.s32.totalorder %s389_s8, %s641_s27  ;;  %p647_p2 = scmp.lt.s32.totalorder %s641_s27, %s641_s27 }
  0x88   :  { %v248_v48 = vpack.c.bf16 %v247_v47, %v247_v47 }
  0x89   :  { %440 = vmatpush3.bf16.msra.mxu1 %v474_v39  ;;  %p648_p3 = por %p647_p2, %p646_p1 }
  0x8a   :  { %441 = vmatprep.subr.bf16.mxu1 %v684_v18  ;;  %v250_v50 = vpack.i.b16 %v248_v48, %v248_v48 }
  0x8b   :  { %p649_p4 = pnand %p648_p3, %p642_p0 }
  0x8c   :  { %v255_v54 = vrot.slane %v250_v50, %v254_v51  ;;  %v265_v3 = vld [vmem:[#allocation3] sm:$0xff]  ;;  %v266_v5 = vld [vmem:[#allocation3 + $0x8] sm:$0xff] }
  0x8d   :  { %442 = vmatpush3.bf16.msra.mxu1 %v475_v40 }
  0x8e   :  { %443 = vmatprep.subr.bf16.mxu1 %v684_v18 }
  0x91   :  { %444 = vmatpush3.bf16.msra.mxu1 %v476_v41 }
  0x92   :  { %445 = vmatprep.subr.bf16.mxu1 %v684_v18 }
  0x95   :  { %446 = vmatpush3.bf16.msra.mxu1 %v477_v42 }
  0x96   :  { %447 = vmatprep.subr.bf16.mxu1 %v684_v18 }
  0x99   :  { %448 = vmatpush3.bf16.msra.mxu1 %v478_v43 }
  0x9a   :  { %449 = vmatprep.subr.bf16.mxu1 %v684_v18 }
  0x9d   :  { %450 = vmatpush3.bf16.msra.mxu1 %v479_v44 }
  0x9e   :  { %451 = vmatprep.subr.bf16.mxu1 %v684_v18 }
  0xa1   :  { %452 = vmatpush3.bf16.msra.mxu1 %v480_v45 }
 0x110   :  { %v128_v7 = vpop.xlane.xlu0 %127 }
 0x111   :  { %v133_v8 = vmul.f32 0.03125, %v128_v7 }
 0x113   :  { %v135_v9 = vsub.f32 %v123_v0, %v133_v8 }
 0x114   :  { %v131_v10 = vpop.xlane.xlu0 %130 }
 0x115   :  { %v134_v11 = vmul.f32 0.03125, %v131_v10  ;;  %v137_v12 = vmul.f32 %v135_v9, %v135_v9 }
 0x117   :  { %v136_v13 = vsub.f32 %v124_v2, %v134_v11  ;;  %v139_v14 = vsel %vm125_vm0, %v137_v12, 0.0 }
 0x118   :  { %140 = vadd.xlane.f32.xlu1 %v139_v14 }
 0x119   :  { %v138_v15 = vmul.f32 %v136_v13, %v136_v13 }
 0x11b   :  { %v142_v16 = vsel %vm125_vm0, %v138_v15, 0.0 }
 0x11c   :  { %143 = vadd.xlane.f32.xlu1 %v142_v16 }
 0x1a5   :  { %v141_v20 = vpop.xlane.xlu1 %140 }
 0x1a6   :  { %v145_v21 = vmul.f32 0.03125, %v141_v20 }
 0x1a8   :  { %v147_v22 = vadd.f32 1e-05, %v145_v21 }
 0x1a9   :  { %v144_v23 = vpop.xlane.xlu1 %143 }
 0x1aa   :  { %481 = vrsqrt.f32 %v147_v22  ;;  %v146_v24 = vmul.f32 0.03125, %v144_v23 }
 0x1ac   :  { %v148_v25 = vadd.f32 1e-05, %v146_v24 }
 0x1ae   :  { %483 = vrsqrt.f32 %v148_v25 }
 0x1b4   :  { %v482_v26 = vpop.eup %481 }
 0x1b5   :  { %v151_v27 = vmul.f32 %v482_v26, %v135_v9 }
 0x1b7   :  { %v160_v30 = vmul.f32 %v403_v28, %v151_v27 }
 0x1b8   :  { %v484_v29 = vpop.eup %483 }
 0x1b9   :  { %v152_v31 = vmul.f32 %v484_v29, %v136_v13  ;;  %v169_v34 = vadd.f32 %v404_v32, %v160_v30 }
 0x1bb   :  { %v161_v33 = vmul.f32 %v403_v28, %v152_v31 }
 0x1bd   :  { %v170_v35 = vadd.f32 %v404_v32, %v161_v33 }
 0x1bf   :  { %v171_v36 = vpack.c.bf16 %v170_v35, %v169_v34 }
 0x1c1   :  { %172 = vst.msk [vmem:[#allocation2] sm:$0xff] %vm125_vm0, %v171_v36 }
 0x1c8   :  { %v184_v37 = vld [vmem:[#allocation2] sm:$0xff] }
 0x1c9   :  { %434 = vmatmul.mubr.msk.bf16.vlgmr.msra.gmra.mrb[0].mxu0 %vm125_vm0, %v184_v37 }
 0x29c   :  { %v239_v52 = vpop.f32.mrb[0].mxu0 }
 0x29d   :  { %v435_v53 = vpop.f32.mrb[1].mxu0 }
 0x29e   :  { %v242_v55 = vpop.f32.mrb[2].mxu0 }
 0x29f   :  { %v246_v56 = vpack.c.bf16 %v242_v55, %v239_v52  ;;  %v436_v57 = vpop.f32.mrb[3].mxu0 }
 0x2a1   :  { %v256_v58 = vadd.bf16 %v255_v54, %v246_v56 }
 0x2a3   :  { %v257_v59 = vmul.bf16 %v256_v58, %v256_v58  ;;  %v262_v0 = vmul.bf16 1056980736, %v256_v58 }
 0x2a5   :  { %v258_v60 = vmul.bf16 1024605458, %v257_v59 }
 0x2a7   :  { %v259_v61 = vadd.bf16 1061961548, %v258_v60 }
 0x2a9   :  { %v260_v62 = vmul.bf16 %v259_v61, %v256_v58 }
 0x2ab   :  { %485 = vtanh.bf16 %v260_v62 }
 0x2b6   :  { %v486_v63 = vpop.eup %485 }
 0x2b7   :  { %v263_v1 = vadd.bf16 1065369472, %v486_v63 }
 0x2b9   :  { %v264_v2 = vmul.bf16 %v263_v1, %v262_v0 }
 0x2bb   :  { %454 = vmatmul.mubr.bf16.vlgmr.msra.gmra.mrb[0].mxu1 %v264_v2 }
 0x38e   :  { %v365_v4 = vpop.f32.mrb[0].mxu1 }
 0x38f   :  { %v372_v6 = vadd.f32 %v365_v4, %v265_v3  ;;  %v455_v7 = vpop.f32.mrb[1].mxu1 }
 0x390   :  { %v368_v8 = vpop.f32.mrb[2].mxu1 }
 0x391   :  { %374 = vst.msk [vmem:[#allocation3] sm:$0xff] %vm125_vm0, %v372_v6  ;;  %v373_v9 = vadd.f32 %v368_v8, %v266_v5  ;;  %v456_v10 = vpop.f32.mrb[3].mxu1 }
 0x393   :  { %375 = vst.msk [vmem:[#allocation3 + $0x8] sm:$0xff] %vm125_vm0, %v373_v9 }
 0x398   :  { %v379_v11 = vld [vmem:[#allocation3] sm:$0xff] }
 0x399   :  { %381 = vst.msk [vmem:[#allocation16] sm:$0xff] %vm125_vm0, %v379_v11 }
 0x39a   :  { %v380_v12 = vld [vmem:[#allocation3 + $0x8] sm:$0xff] }
 0x39b   :  { %382 = vst.msk [vmem:[#allocation16 + $0x8] sm:$0xff] %vm125_vm0, %v380_v12 }
 0x39c   :  { %652 = shalt.err (!%p649_p4)
}
 0x39d   :  { %s653_s18 = scalar_lea.hbm %s862_s7, 256 }
 0x39e   :  { %p654_p5 = scmp.ne.s32.totalorder %s862_s7, %s653_s18  ;;  %p657_p6 = scmp.lt.u32.totalorder %s653_s18, %s862_s7 }
 0x3a0   :  { %p659_p7 = pnand %p657_p6, %p654_p5 }
 0x3a2   :  { %662 = shalt.err (!%p659_p7)
}
 0x3a3   :  { %394 = dma.vmem_to_hbm [thread:$0]  %s389_s8, 256, %s862_s7, [#allocation6], %s679_s5, %s679_s5, %s680_s1  }
 0x3a4   :  { %671 = dma.done.wait [#allocation6], 256  }
 0x3a5   :  { %672 = vsyncadd [#allocation6], 4294967040 }
 0x3a6   :  { %398 = vsyncpa [#allocation5], 1 }
 0x3a7   :  { %399 = vsyncpa [#allocation8], 1 }
 0x3a8   :  { %400 = vsyncpa [#allocation11], 1 }
 0x3a9   :  { %401 = vsyncpa [#allocation14], 1 }
 0x3aa   :  { %402 = vsyncpa [#allocation6], 1 }

// kernel: tpu_custom_call.1
= control target key start
LH: loop header
LB: loop body
LE: loop exit
PB: predicated region body
PF: predicated region fallthrough
CT: control target
= control target key end

     0   :  { %12 = vsyncpa [#allocation5], 0  ;;  %s855_s0 = inlined_call_operand.hbm [shape: f32[16,32], index: 0, kind: input, shape index: {}]   ;;  %s856_s1 = inlined_call_operand.hbm [shape: f32[1,32], index: 1, kind: input, shape index: {}]   ;;  %s857_s2 = inlined_call_operand.hbm [shape: f32[1,32], index: 2, kind: input, shape index: {}]   ;;  %s858_s3 = inlined_call_operand.hbm [shape: bf16[32,128], index: 3, kind: input, shape index: {}]   ;;  %s859_s4 = inlined_call_operand.hbm [shape: f32[1,128], index: 4, kind: input, shape index: {}]   ;;  %s860_s5 = inlined_call_operand.hbm [shape: bf16[128,32], index: 5, kind: input, shape index: {}]   ;;  %s861_s6 = inlined_call_operand.hbm [shape: f32[1,32], index: 6, kind: input, shape index: {}]   ;;  %s862_s7 = inlined_call_operand.hbm [shape: f32[16,32], index: 7, kind: output, shape index: {}]  }
   0x1   :  { %13 = vsyncpa [#allocation8], 0 }
   0x2   :  { %14 = vsyncpa [#allocation11], 0 }
   0x3   :  { %15 = vsyncpa [#allocation14], 0 }
   0x4   :  { %16 = vsyncpa [#allocation6], 0  ;;  %s673_s24 = smov [#allocation7]   ;;  %s674_s26 = smov [#allocation10]  }
   0x5   :  { %s35_s25 = sshll.u32 %s673_s24, 4  ;;  %s54_s27 = sshll.u32 %s674_s26, 4  ;;  %s36_s25 = int_to_ptr.vmem [resolvable:$true] %s35_s25  ;;  %s727_s27 = int_to_ptr.vmem [resolvable:$true] %s54_s27 }
   0x6   :  { %s487_s30 = scalar_lea.hbm %s856_s1, 16 }
   0x7   :  { %p488_p0 = scmp.ne.s32.totalorder %s856_s1, %s487_s30  ;;  %p491_p1 = scmp.lt.u32.totalorder %s487_s30, %s856_s1 }
   0x9   :  { %p493_p2 = pnand %p491_p1, %p488_p0 }
   0xb   :  { %496 = shalt.err (!%p493_p2)
}
   0xc   :  { %s497_s12 = scalar_lea.vmem %s36_s25, 16  ;;  %s501_s13 = scalar_lea.vmem %s36_s25, 32 }
   0xd   :  { %p498_p3 = scmp.ne.s32.totalorder %s36_s25, %s497_s12  ;;  %p502_p4 = scmp.lt.s32.totalorder %s36_s25, %s36_s25 }
   0xe   :  { %p503_p5 = scmp.lt.s32.totalorder %s501_s13, %s497_s12 }
  0x10   :  { %p504_p6 = por %p503_p5, %p502_p4 }
  0x12   :  { %p505_p7 = pnand %p504_p6, %p498_p3 }
  0x14   :  { %508 = shalt.err (!%p505_p7)
}
  0x15   :  { %38 = dma.hbm_to_vmem [thread:$0]  %s856_s1, 16, %s36_s25, [#allocation8]  }
  0x16   :  { %s509_s18 = scalar_lea.hbm %s858_s3, 256 }
  0x17   :  { %p510_p8 = scmp.ne.s32.totalorder %s858_s3, %s509_s18  ;;  %p513_p9 = scmp.lt.u32.totalorder %s509_s18, %s858_s3 }
  0x19   :  { %p515_p10 = pnand %p513_p9, %p510_p8 }
  0x1b   :  { %518 = shalt.err (!%p515_p10)
}
  0x1c   :  { %s519_s23 = scalar_lea.vmem %s727_s27, 256  ;;  %p524_p12 = scmp.lt.s32.totalorder %s727_s27, %s727_s27 }
  0x1d   :  { %p520_p11 = scmp.ne.s32.totalorder %s727_s27, %s519_s23  ;;  %p525_p13 = scmp.lt.s32.totalorder %s519_s23, %s519_s23 }
  0x1f   :  { %p526_p0 = por %p525_p13, %p524_p12 }
  0x21   :  { %p527_p1 = pnand %p526_p0, %p520_p11 }
  0x23   :  { %530 = shalt.err (!%p527_p1)
}
  0x24   :  { %s675_s1 = smov 64   ;;  %s676_s24 = smov 4  }
  0x25   :  { %60 = dma.hbm_to_vmem [thread:$0]  %s858_s3, 256, %s727_s27, [#allocation11], %s675_s1, %s675_s1, %s676_s24  }
  0x26   :  { %s677_s28 = smov [#allocation13]   ;;  %s678_s30 = smov [#allocation4]  }
  0x27   :  { %s76_s29 = sshll.u32 %s677_s28, 4  ;;  %s22_s8 = sshll.u32 %s678_s30, 4  ;;  %s77_s29 = int_to_ptr.vmem [resolvable:$true] %s76_s29  ;;  %s758_s8 = int_to_ptr.vmem [resolvable:$true] %s22_s8 }
  0x28   :  { %s531_s11 = scalar_lea.hbm %s860_s5, 1024 }
  0x29   :  { %p532_p2 = scmp.ne.s32.totalorder %s860_s5, %s531_s11  ;;  %p535_p3 = scmp.lt.u32.totalorder %s531_s11, %s860_s5 }
  0x2b   :  { %p537_p4 = pnand %p535_p3, %p532_p2 }
  0x2d   :  { %540 = shalt.err (!%p537_p4)
}
  0x2e   :  { %s541_s3 = scalar_lea.vmem %s77_s29, 1024  ;;  %p546_p6 = scmp.lt.s32.totalorder %s77_s29, %s77_s29 }
  0x2f   :  { %p542_p5 = scmp.ne.s32.totalorder %s77_s29, %s541_s3  ;;  %p547_p7 = scmp.lt.s32.totalorder %s541_s3, %s541_s3 }
  0x31   :  { %p548_p8 = por %p547_p7, %p546_p6 }
  0x33   :  { %p549_p9 = pnand %p548_p8, %p542_p5 }
  0x35   :  { %552 = shalt.err (!%p549_p9)
}
  0x36   :  { %82 = dma.hbm_to_vmem [thread:$0]  %s860_s5, 1024, %s77_s29, [#allocation14], %s675_s1, %s675_s1, %s676_s24  }
  0x37   :  { %s553_s19 = scalar_lea.hbm %s855_s0, 256 }
  0x38   :  { %p554_p10 = scmp.ne.s32.totalorder %s855_s0, %s553_s19  ;;  %p557_p11 = scmp.lt.u32.totalorder %s553_s19, %s855_s0 }
  0x3a   :  { %p559_p12 = pnand %p557_p11, %p554_p10 }
  0x3c   :  { %562 = shalt.err (!%p559_p12)
}
  0x3d   :  { %s563_s25 = scalar_lea.vmem %s758_s8, 256  ;;  %p568_p0 = scmp.lt.s32.totalorder %s758_s8, %s758_s8 }
  0x3e   :  { %p564_p13 = scmp.ne.s32.totalorder %s758_s8, %s563_s25  ;;  %p569_p1 = scmp.lt.s32.totalorder %s563_s25, %s563_s25 }
  0x40   :  { %p570_p2 = por %p569_p1, %p568_p0 }
  0x42   :  { %p571_p3 = pnand %p570_p2, %p564_p13 }
  0x44   :  { %574 = shalt.err (!%p571_p3)
}
  0x45   :  { %s679_s5 = smov 128   ;;  %s680_s1 = smov 8  }
  0x46   :  { %28 = dma.hbm_to_vmem [thread:$0]  %s855_s0, 256, %s758_s8, [#allocation5], %s679_s5, %s679_s5, %s680_s1  }
  0x47   :  { %s681_s28 = smov [#allocation9]   ;;  %s682_s30 = smov [#allocation12]  }
  0x48   :  { %s45_s29 = sshll.u32 %s681_s28, 4  ;;  %s67_s9 = sshll.u32 %s682_s30, 4  ;;  %s46_s29 = int_to_ptr.vmem [resolvable:$true] %s45_s29  ;;  %s68_s9 = int_to_ptr.vmem [resolvable:$true] %s67_s9 }
  0x49   :  { %s575_s12 = scalar_lea.hbm %s857_s2, 16 }
  0x4a   :  { %p576_p4 = scmp.ne.s32.totalorder %s857_s2, %s575_s12  ;;  %p579_p5 = scmp.lt.u32.totalorder %s575_s12, %s857_s2 }
  0x4c   :  { %p581_p6 = pnand %p579_p5, %p576_p4 }
  0x4e   :  { %584 = shalt.err (!%p581_p6)
}
  0x4f   :  { %s585_s0 = scalar_lea.vmem %s46_s29, 16  ;;  %s589_s8 = scalar_lea.vmem %s46_s29, 32 }
  0x50   :  { %p586_p7 = scmp.ne.s32.totalorder %s46_s29, %s585_s0  ;;  %p590_p8 = scmp.lt.s32.totalorder %s46_s29, %s46_s29 }
  0x51   :  { %p591_p9 = scmp.lt.s32.totalorder %s589_s8, %s585_s0 }
  0x53   :  { %p592_p10 = por %p591_p9, %p590_p8 }
  0x55   :  { %p593_p11 = pnand %p592_p10, %p586_p7 }
  0x57   :  { %596 = shalt.err (!%p593_p11)
}
  0x58   :  { %48 = dma.hbm_to_vmem [thread:$0]  %s857_s2, 16, %s46_s29, [#allocation8]  }
  0x59   :  { %s597_s19 = scalar_lea.hbm %s859_s4, 16 }
  0x5a   :  { %p598_p12 = scmp.ne.s32.totalorder %s859_s4, %s597_s19  ;;  %p601_p13 = scmp.lt.u32.totalorder %s597_s19, %s859_s4 }
  0x5c   :  { %p603_p0 = pnand %p601_p13, %p598_p12 }
  0x5e   :  { %606 = shalt.err (!%p603_p0)
}
  0x5f   :  { %s607_s25 = scalar_lea.vmem %s68_s9, 16  ;;  %s611_s24 = scalar_lea.vmem %s68_s9, 32 }
  0x60   :  { %p608_p1 = scmp.ne.s32.totalorder %s68_s9, %s607_s25  ;;  %p612_p2 = scmp.lt.s32.totalorder %s68_s9, %s68_s9 }
  0x61   :  { %p613_p3 = scmp.lt.s32.totalorder %s611_s24, %s607_s25 }
  0x63   :  { %p614_p4 = por %p613_p3, %p612_p2 }
  0x65   :  { %p615_p5 = pnand %p614_p4, %p608_p1 }
  0x67   :  { %618 = shalt.err (!%p615_p5)
}
  0x68   :  { %70 = dma.hbm_to_vmem [thread:$0]  %s859_s4, 16, %s68_s9, [#allocation11]  }
  0x69   :  { %s683_s28 = smov [#allocation15]   ;;  %s619_s11 = scalar_lea.hbm %s861_s6, 16 }
  0x6a   :  { %s89_s29 = sshll.u32 %s683_s28, 4  ;;  %p620_p6 = scmp.ne.s32.totalorder %s861_s6, %s619_s11  ;;  %s90_s29 = int_to_ptr.vmem [resolvable:$true] %s89_s29 }
  0x6b   :  { %p623_p7 = scmp.lt.u32.totalorder %s619_s11, %s861_s6 }
  0x6d   :  { %p625_p8 = pnand %p623_p7, %p620_p6 }
  0x6f   :  { %628 = shalt.err (!%p625_p8)
}
  0x70   :  { %s629_s3 = scalar_lea.vmem %s90_s29, 16  ;;  %s633_s4 = scalar_lea.vmem %s90_s29, 32 }
  0x71   :  { %p630_p9 = scmp.ne.s32.totalorder %s90_s29, %s629_s3  ;;  %p634_p10 = scmp.lt.s32.totalorder %s90_s29, %s90_s29 }
  0x72   :  { %p635_p11 = scmp.lt.s32.totalorder %s633_s4, %s629_s3 }
  0x74   :  { %p636_p12 = por %p635_p11, %p634_p10 }
  0x76   :  { %p637_p13 = pnand %p636_p12, %p630_p9 }
  0x78   :  { %640 = shalt.err (!%p637_p13)
}
  0x79   :  { %92 = dma.hbm_to_vmem [thread:$0]  %s861_s6, 16, %s90_s29, [#allocation14]  }
  0x7a   :  { %663 = dma.done.wait [#allocation5], 256  }
  0x7b   :  { %664 = vsyncadd [#allocation5], 4294967040 }
  0x7c   :  { %665 = dma.done.wait [#allocation8], 32  }
  0x7d   :  { %666 = vsyncadd [#allocation8], 4294967264 }
  0x7e   :  { %667 = dma.done.wait [#allocation11], 272  }
  0x7f   :  { %668 = vsyncadd [#allocation11], 4294967024 }
  0x80   :  { %669 = dma.done.wait [#allocation14], 1040  }
  0x81   :  { %670 = vsyncadd [#allocation14], 4294966256  ;;  %vm125_vm0 = vcmask 261120   ;;  %v123_v0 = vld [vmem:[#allocation4] sm:$0xff]  ;;  %v124_v2 = vld [vmem:[#allocation4 + $0x8] sm:$0xff]  ;;  %v684_v18 = vmov 0.0   ;;  %v252_v46 = vlaneseq }
  0x82   :  { %v405_v1 = vld [vmem:[#allocation15] ss:$0 sm:$0xff]  ;;  %v126_v3 = vsel %vm125_vm0, %v123_v0, 0.0  ;;  %v129_v5 = vsel %vm125_vm0, %v124_v2, 0.0  ;;  %v471_v17 = vld [vmem:[#allocation10] sm:$0xff]   ;;  %429 = vmatprep.subr.bf16.mxu0 %v684_v18  ;;  %437 = vmatprep.subr.bf16.mxu1 %v684_v18  ;;  %v472_v19 = vld [vmem:[#allocation10 + $0x8] sm:$0xff]  }
  0x83   :  { %v180_v4 = vadd.f32 %v405_v1, %v123_v0  ;;  %v181_v6 = vadd.f32 %v405_v1, %v124_v2  ;;  %127 = vadd.xlane.f32.xlu0 %v126_v3  ;;  %430 = vmatpush3.bf16.msra.mxu0 %v471_v17  ;;  %vm685_vm1 = vmmov 0   ;;  %v403_v28 = vld [vmem:[#allocation7] ss:$0 sm:$0xff]  ;;  %v404_v32 = vld [vmem:[#allocation9] ss:$0 sm:$0xff]  ;;  %v473_v38 = vld [vmem:[#allocation13] sm:$0xff]  }
  0x84   :  { %433 = vmatprep.mubr.msk.bf16.mxu0 %vm685_vm1, %v684_v18  ;;  %431 = vmatprep.subr.bf16.mxu0 %v684_v18  ;;  %v474_v39 = vld [vmem:[#allocation13 + $0x8] sm:$0xff]   ;;  %v475_v40 = vld [vmem:[#allocation13 + $0x10] sm:$0xff]   ;;  %v476_v41 = vld [vmem:[#allocation13 + $0x18] sm:$0xff]   ;;  %v253_v49 = vshrl.u32 %v252_v46, 7  ;;  %s686_s6 = smov [#allocation16]  }
  0x85   :  { %182 = vst.msk [vmem:[#allocation3] sm:$0xff] %vm125_vm0, %v180_v4  ;;  %183 = vst.msk [vmem:[#allocation3 + $0x8] sm:$0xff] %vm125_vm0, %v181_v6  ;;  %453 = vmatprep.mubr.msk.bf16.mxu1 %vm685_vm1, %v684_v18  ;;  %438 = vmatpush3.bf16.msra.mxu1 %v473_v38  ;;  %v477_v42 = vld [vmem:[#allocation13 + $0x20] sm:$0xff]   ;;  %v478_v43 = vld [vmem:[#allocation13 + $0x28] sm:$0xff]   ;;  %s388_s8 = sshll.u32 %s686_s6, 4  ;;  %s389_s8 = int_to_ptr.vmem [resolvable:$true] %s388_s8 }
  0x86   :  { %439 = vmatprep.subr.bf16.mxu1 %v684_v18  ;;  %v479_v44 = vld [vmem:[#allocation13 + $0x30] sm:$0xff]   ;;  %v480_v45 = vld [vmem:[#allocation13 + $0x38] sm:$0xff]   ;;  %v254_v51 = vsub.s32 0, %v253_v49  ;;  %s641_s27 = scalar_lea.vmem %s389_s8, 256  ;;  %p646_p1 = scmp.lt.s32.totalorder %s389_s8, %s389_s8 }
  0x87   :  { %130 = vadd.xlane.f32.xlu0 %v129_v5  ;;  %432 = vmatpush3.bf16.msra.mxu0 %v472_v19  ;;  %v247_v47 = vld [vmem:[#allocation12] sm:$0x1]  ;;  %p642_p0 = scmp.ne.s32.totalorder %s389_s8, %s641_s27  ;;  %p647_p2 = scmp.lt.s32.totalorder %s641_s27, %s641_s27 }
  0x88   :  { %v248_v48 = vpack.c.bf16 %v247_v47, %v247_v47 }
  0x89   :  { %440 = vmatpush3.bf16.msra.mxu1 %v474_v39  ;;  %p648_p3 = por %p647_p2, %p646_p1 }
  0x8a   :  { %441 = vmatprep.subr.bf16.mxu1 %v684_v18  ;;  %v250_v50 = vpack.i.b16 %v248_v48, %v248_v48 }
  0x8b   :  { %p649_p4 = pnand %p648_p3, %p642_p0 }
  0x8c   :  { %v255_v54 = vrot.slane %v250_v50, %v254_v51  ;;  %v265_v3 = vld [vmem:[#allocation3] sm:$0xff]  ;;  %v266_v5 = vld [vmem:[#allocation3 + $0x8] sm:$0xff] }
  0x8d   :  { %442 = vmatpush3.bf16.msra.mxu1 %v475_v40 }
  0x8e   :  { %443 = vmatprep.subr.bf16.mxu1 %v684_v18 }
  0x91   :  { %444 = vmatpush3.bf16.msra.mxu1 %v476_v41 }
  0x92   :  { %445 = vmatprep.subr.bf16.mxu1 %v684_v18 }
  0x95   :  { %446 = vmatpush3.bf16.msra.mxu1 %v477_v42 }
  0x96   :  { %447 = vmatprep.subr.bf16.mxu1 %v684_v18 }
  0x99   :  { %448 = vmatpush3.bf16.msra.mxu1 %v478_v43 }
  0x9a   :  { %449 = vmatprep.subr.bf16.mxu1 %v684_v18 }
  0x9d   :  { %450 = vmatpush3.bf16.msra.mxu1 %v479_v44 }
  0x9e   :  { %451 = vmatprep.subr.bf16.mxu1 %v684_v18 }
  0xa1   :  { %452 = vmatpush3.bf16.msra.mxu1 %v480_v45 }
 0x110   :  { %v128_v7 = vpop.xlane.xlu0 %127 }
 0x111   :  { %v133_v8 = vmul.f32 0.03125, %v128_v7 }
 0x113   :  { %v135_v9 = vsub.f32 %v123_v0, %v133_v8 }
 0x114   :  { %v131_v10 = vpop.xlane.xlu0 %130 }
 0x115   :  { %v134_v11 = vmul.f32 0.03125, %v131_v10  ;;  %v137_v12 = vmul.f32 %v135_v9, %v135_v9 }
 0x117   :  { %v136_v13 = vsub.f32 %v124_v2, %v134_v11  ;;  %v139_v14 = vsel %vm125_vm0, %v137_v12, 0.0 }
 0x118   :  { %140 = vadd.xlane.f32.xlu1 %v139_v14 }
 0x119   :  { %v138_v15 = vmul.f32 %v136_v13, %v136_v13 }
 0x11b   :  { %v142_v16 = vsel %vm125_vm0, %v138_v15, 0.0 }
 0x11c   :  { %143 = vadd.xlane.f32.xlu1 %v142_v16 }
 0x1a5   :  { %v141_v20 = vpop.xlane.xlu1 %140 }
 0x1a6   :  { %v145_v21 = vmul.f32 0.03125, %v141_v20 }
 0x1a8   :  { %v147_v22 = vadd.f32 1e-05, %v145_v21 }
 0x1a9   :  { %v144_v23 = vpop.xlane.xlu1 %143 }
 0x1aa   :  { %481 = vrsqrt.f32 %v147_v22  ;;  %v146_v24 = vmul.f32 0.03125, %v144_v23 }
 0x1ac   :  { %v148_v25 = vadd.f32 1e-05, %v146_v24 }
 0x1ae   :  { %483 = vrsqrt.f32 %v148_v25 }
 0x1b4   :  { %v482_v26 = vpop.eup %481 }
 0x1b5   :  { %v151_v27 = vmul.f32 %v482_v26, %v135_v9 }
 0x1b7   :  { %v160_v30 = vmul.f32 %v403_v28, %v151_v27 }
 0x1b8   :  { %v484_v29 = vpop.eup %483 }
 0x1b9   :  { %v152_v31 = vmul.f32 %v484_v29, %v136_v13  ;;  %v169_v34 = vadd.f32 %v404_v32, %v160_v30 }
 0x1bb   :  { %v161_v33 = vmul.f32 %v403_v28, %v152_v31 }
 0x1bd   :  { %v170_v35 = vadd.f32 %v404_v32, %v161_v33 }
 0x1bf   :  { %v171_v36 = vpack.c.bf16 %v170_v35, %v169_v34 }
 0x1c1   :  { %172 = vst.msk [vmem:[#allocation2] sm:$0xff] %vm125_vm0, %v171_v36 }
 0x1c8   :  { %v184_v37 = vld [vmem:[#allocation2] sm:$0xff] }
 0x1c9   :  { %434 = vmatmul.mubr.msk.bf16.vlgmr.msra.gmra.mrb[0].mxu0 %vm125_vm0, %v184_v37 }
 0x29c   :  { %v239_v52 = vpop.f32.mrb[0].mxu0 }
 0x29d   :  { %v435_v53 = vpop.f32.mrb[1].mxu0 }
 0x29e   :  { %v242_v55 = vpop.f32.mrb[2].mxu0 }
 0x29f   :  { %v246_v56 = vpack.c.bf16 %v242_v55, %v239_v52  ;;  %v436_v57 = vpop.f32.mrb[3].mxu0 }
 0x2a1   :  { %v256_v58 = vadd.bf16 %v255_v54, %v246_v56 }
 0x2a3   :  { %v257_v59 = vmul.bf16 %v256_v58, %v256_v58  ;;  %v262_v0 = vmul.bf16 1056980736, %v256_v58 }
 0x2a5   :  { %v258_v60 = vmul.bf16 1024605458, %v257_v59 }
 0x2a7   :  { %v259_v61 = vadd.bf16 1061961548, %v258_v60 }
 0x2a9   :  { %v260_v62 = vmul.bf16 %v259_v61, %v256_v58 }
 0x2ab   :  { %485 = vtanh.bf16 %v260_v62 }
 0x2b6   :  { %v486_v63 = vpop.eup %485 }
 0x2b7   :  { %v263_v1 = vadd.bf16 1065369472, %v486_v63 }
 0x2b9   :  { %v264_v2 = vmul.bf16 %v263_v1, %v262_v0 }
 0x2bb   :  { %454 = vmatmul.mubr.bf16.vlgmr.msra.gmra.mrb[0].mxu1 %v264_v2 }
 0x38e   :  { %v365_v4 = vpop.f32.mrb[0].mxu1 }
 0x38f   :  { %v372_v6 = vadd.f32 %v365_v4, %v265_v3  ;;  %v455_v7 = vpop.f32.mrb[1].mxu1 }
 0x390   :  { %v368_v8 = vpop.f32.mrb[2].mxu1 }
 0x391   :  { %374 = vst.msk [vmem:[#allocation3] sm:$0xff] %vm125_vm0, %v372_v6  ;;  %v373_v9 = vadd.f32 %v368_v8, %v266_v5  ;;  %v456_v10 = vpop.f32.mrb[3].mxu1 }
 0x393   :  { %375 = vst.msk [vmem:[#allocation3 + $0x8] sm:$0xff] %vm125_vm0, %v373_v9 }
 0x398   :  { %v379_v11 = vld [vmem:[#allocation3] sm:$0xff] }
 0x399   :  { %381 = vst.msk [vmem:[#allocation16] sm:$0xff] %vm125_vm0, %v379_v11 }
 0x39a   :  { %v380_v12 = vld [vmem:[#allocation3 + $0x8] sm:$0xff] }
 0x39b   :  { %382 = vst.msk [vmem:[#allocation16 + $0x8] sm:$0xff] %vm125_vm0, %v380_v12 }
 0x39c   :  { %652 = shalt.err (!%p649_p4)
}
 0x39d   :  { %s653_s18 = scalar_lea.hbm %s862_s7, 256 }
 0x39e   :  { %p654_p5 = scmp.ne.s32.totalorder %s862_s7, %s653_s18  ;;  %p657_p6 = scmp.lt.u32.totalorder %s653_s18, %s862_s7 }
 0x3a0   :  { %p659_p7 = pnand %p657_p6, %p654_p5 }
 0x3a2   :  { %662 = shalt.err (!%p659_p7)
}
 0x3a3   :  { %394 = dma.vmem_to_hbm [thread:$0]  %s389_s8, 256, %s862_s7, [#allocation6], %s679_s5, %s679_s5, %s680_s1  }
 0x3a4   :  { %671 = dma.done.wait [#allocation6], 256  }
 0x3a5   :  { %672 = vsyncadd [#allocation6], 4294967040 }
 0x3a6   :  { %398 = vsyncpa [#allocation5], 1 }
 0x3a7   :  { %399 = vsyncpa [#allocation8], 1 }
 0x3a8   :  { %400 = vsyncpa [#allocation11], 1 }
 0x3a9   :  { %401 = vsyncpa [#allocation14], 1 }
 0x3aa   :  { %402 = vsyncpa [#allocation6], 1 }

</bundles_post_ra>
